<compile_context>
chip_gen: v5e
topology: v5e:2x2
jax: 0.10.0
libtpu: 0.0.40
codegen_flags: <defaults>
</compile_context>

<pallas_src>
import functools

import jax
import jax.numpy as jnp
from jax.experimental import pallas as pl
from jax.experimental.pallas import tpu as pltpu


def _gcn_class_kernel(x_ref, adj_ref, w_ref, b_ref, out_ref, *,
                      bb, n, fin, hid, hid2, classes):
    """One (bb, N, *) batch slab per grid step. All matmuls in-kernel."""
    x = x_ref[...]                     # (bb, n, fin)
    adj = adj_ref[...]                 # (bb, n, n)
    w = w_ref[...]                     # packed weights (R, wcols)
    bias = b_ref[...]                  # packed biases  (6, wcols)

    # --- static slices of the packed parameter slabs -------------------------
    o = 0
    gw1 = w[o:o + fin, 0:hid]; o += fin
    gw2 = w[o:o + hid, 0:hid]; o += hid
    gw3 = w[o:o + hid, 0:hid]; o += hid
    lw1 = w[o:o + hid, 0:hid]; o += hid
    lw2 = w[o:o + hid, 0:hid2]; o += hid
    lw3 = w[o:o + hid2, 0:classes]

    gb1 = bias[0:1, 0:hid].astype(jnp.float32)
    gb2 = bias[1:2, 0:hid].astype(jnp.float32)
    gb3 = bias[2:3, 0:hid].astype(jnp.float32)
    lb1 = bias[3:4, 0:hid].astype(jnp.float32)
    lb2 = bias[4:5, 0:hid2].astype(jnp.float32)
    lb3 = bias[5:6, 0:classes].astype(jnp.float32)

    m = bb * n  # rows fed to the MXU for all dense matmuls

    def aggregate(flat, d):
        # per-batch adj @ support, flattened back to (m, d)
        s = flat.reshape(bb, n, d)
        a = jnp.einsum('bnm,bmf->bnf', adj, s,
                       preferred_element_type=jnp.float32)
        return a.reshape(m, d)

    def dense(flat, wmat, bvec):
        return jnp.dot(flat, wmat, preferred_element_type=jnp.float32) + bvec

    # GCL1 with associativity: (adj @ x) @ W1 + b1   (Fin < hidden)
    h = jnp.maximum(dense(aggregate(x.reshape(m, fin), fin), gw1, gb1), 0.0)
    # GCL2: adj @ (h @ W2) + b2
    h = jnp.maximum(
        aggregate(jnp.dot(h, gw2, preferred_element_type=jnp.float32), hid)
        + gb2, 0.0)
    # GCL3
    h = jnp.maximum(
        aggregate(jnp.dot(h, gw3, preferred_element_type=jnp.float32), hid)
        + gb3, 0.0)

    # l1 -> dropout -> relu
    # TODO(synk): training-mode dropout (p=0.1) not applied; eval semantics.
    h = jnp.maximum(dense(h, lw1, lb1), 0.0)
    # l2 -> relu
    h = jnp.maximum(dense(h, lw2, lb2), 0.0)
    # l3 -> log_softmax over the class axis
    logits = dense(h, lw3, lb3)                          # (m, classes)
    z = logits - jnp.max(logits, axis=-1, keepdims=True)
    lse = jnp.log(jnp.sum(jnp.exp(z), axis=-1, keepdims=True))
    logp = z - lse                                       # (m, classes)

    # Emit the (classes, N) layout per batch element directly (no wrapper
    # transpose): one small 2-D transpose + static lane-slice stores.
    logp_t = logp.T.astype(out_ref.dtype)                # (classes, m)
    for bi in range(bb):                                 # bb is small & static
        out_ref[bi, :, :] = logp_t[:, bi * n:(bi + 1) * n]


def pack_params(params):
    """Pack the 12 weight/bias tensors into one weight slab + one bias slab."""
    (gw1, gb1, gw2, gb2, gw3, gb3, lw1, lb1, lw2, lb2, lw3, lb3) = params
    fin, hid = gw1.shape
    hid2 = lw2.shape[1]
    classes = lw3.shape[1]
    wcols = max(hid, hid2, classes)

    def padw(wm):
        wm = jnp.asarray(wm, jnp.float32)
        return jnp.pad(wm, ((0, 0), (0, wcols - wm.shape[1])))

    def padb(bv):
        bv = jnp.asarray(bv, jnp.float32).reshape(1, -1)
        return jnp.pad(bv, ((0, 0), (0, wcols - bv.shape[1])))

    w_pack = jnp.concatenate(
        [padw(gw1), padw(gw2), padw(gw3), padw(lw1), padw(lw2), padw(lw3)],
        axis=0)
    b_pack = jnp.concatenate(
        [padb(gb1), padb(gb2), padb(gb3), padb(lb1), padb(lb2), padb(lb3)],
        axis=0)
    return w_pack, b_pack, dict(fin=fin, hid=hid, hid2=hid2, classes=classes)


def gcn_class_forward(x, adj, params, *, compute_dtype=jnp.float32):
    """x: (B, N, Fin), adj: (B, N, N). Returns (B, classes, N) log-probs."""
    B, N, Fin = x.shape
    w_pack, b_pack, dims = pack_params(params)
    hid, hid2, classes = dims['hid'], dims['hid2'], dims['classes']
    assert dims['fin'] == Fin

    # Optionally stream x/adj as bf16 (f32 accumulation in-kernel). Default is
    # f32 so results match the pure-JAX reference tightly.
    x = x.astype(compute_dtype)
    adj = adj.astype(compute_dtype)
    itemsize = jnp.dtype(compute_dtype).itemsize

    # --- pick batch-block size Bb: fold batches until either the MXU M-dim is
    # well fed (bb*N ~ 512 rows) or a conservative VMEM budget is hit (blocks
    # are double-buffered; default scoped VMEM limit is 32 MiB).
    per_batch_bytes = (
        (N * N + N * Fin) * itemsize * 2     # x + adj blocks, double-buffered
        + classes * N * 4 * 2                # output block, double-buffered
        + N * hid * 4 * 6)                   # f32 intermediates (rough)
    budget = 24 * 1024 * 1024
    bb = max(1, min(B, budget // max(per_batch_bytes, 1)))
    bb = min(bb, max(1, 512 // max(N, 1)))
    while B % bb:                            # keep blocks exact (no remainder)
        bb -= 1
    # TODO(synk): on v7x (2 TensorCores) a fully folded grid of length 1 leaves
    # one core idle; a second "parallel" grid axis over node tiles would fix it.

    kernel = functools.partial(
        _gcn_class_kernel, bb=bb, n=N, fin=Fin, hid=hid, hid2=hid2,
        classes=classes)

    out = pl.pallas_call(
        kernel,
        out_shape=jax.ShapeDtypeStruct((B, classes, N), jnp.float32),
        grid_spec=pltpu.PrefetchScalarGridSpec(
            num_scalar_prefetch=0,
            grid=(B // bb,),
            in_specs=[
                pl.BlockSpec((bb, N, Fin), lambda i: (i, 0, 0)),   # x
                pl.BlockSpec((bb, N, N), lambda i: (i, 0, 0)),     # adj
                pl.BlockSpec(w_pack.shape, lambda i: (0, 0)),      # weights
                pl.BlockSpec(b_pack.shape, lambda i: (0, 0)),      # biases
            ],
            out_specs=pl.BlockSpec((bb, classes, N), lambda i: (i, 0, 0)),
        ),
        compiler_params=pltpu.CompilerParams(
            dimension_semantics=("parallel",)),
    )(x, adj, w_pack, b_pack)

    # Already in torch layout: log_softmax(out, dim=2).transpose(1, 2)
    return out


def init_params(key, in_features, hidden_dim, classes):
    """Deterministic synthetic parameters (shapes from GCN_Class.__init__)."""
    ks = jax.random.split(key, 12)

    def u(k, shape, scale=0.1):
        return (jax.random.uniform(k, shape, jnp.float32) - 0.5) * 2.0 * scale

    # GraphConvolutionnalLayer weights: (in, out) + bias (out,)
    gw1 = u(ks[0], (in_features, hidden_dim)); gb1 = u(ks[1], (1, hidden_dim))
    gw2 = u(ks[2], (hidden_dim, hidden_dim));  gb2 = u(ks[3], (1, hidden_dim))
    gw3 = u(ks[4], (hidden_dim, hidden_dim));  gb3 = u(ks[5], (1, hidden_dim))
    # nn.Linear: weight (out, in) in PyTorch -> pre-transpose to (in, out)
    lw1 = u(ks[6], (hidden_dim, hidden_dim)).T;       lb1 = u(ks[7], (1, hidden_dim))
    lw2 = u(ks[8], (hidden_dim // 2, hidden_dim)).T;  lb2 = u(ks[9], (1, hidden_dim // 2))
    lw3 = u(ks[10], (classes, hidden_dim // 2)).T;    lb3 = u(ks[11], (1, classes))
    return (gw1, gb1, gw2, gb2, gw3, gb3, lw1, lb1, lw2, lb2, lw3, lb3)


def reference_forward(x, adj, params):
    """Pure-JAX reference (faithful to the PyTorch forward, eval mode)."""
    (gw1, gb1, gw2, gb2, gw3, gb3, lw1, lb1, lw2, lb2, lw3, lb3) = params

    def gcl(h, w, b):
        return jnp.einsum('bnm,bmf->bnf', adj, h @ w) + b

    h = jax.nn.relu(gcl(x, gw1, gb1))
    h = jax.nn.relu(gcl(h, gw2, gb2))
    h = jax.nn.relu(gcl(h, gw3, gb3))
    h = jax.nn.relu(h @ lw1 + lb1)
    h = jax.nn.relu(h @ lw2 + lb2)
    logits = h @ lw3 + lb3
    return jnp.transpose(jax.nn.log_softmax(logits, axis=2), (0, 2, 1))


if __name__ == "__main__":
    B, N = 2, 16
    in_features, hidden_dim, classes = 8, 32, 4

    key = jax.random.PRNGKey(0)
    kx, kadj, kp = jax.random.split(key, 3)

    x = jax.random.normal(kx, (B, N, in_features), jnp.float32)
    # symmetric row-normalized adjacency with self loops (synthetic)
    a = (jax.random.uniform(kadj, (B, N, N)) > 0.7).astype(jnp.float32)
    a = jnp.minimum(a + jnp.transpose(a, (0, 2, 1)), 1.0) + jnp.eye(N)[None]
    deg = jnp.sum(a, axis=-1, keepdims=True)
    adj = a / deg

    params = init_params(kp, in_features, hidden_dim, classes)

    out = gcn_class_forward(x, adj, params)
    jax.block_until_ready(out)

    ref = reference_forward(x, adj, params)
    assert out.shape == (B, classes, N), out.shape
    assert jnp.allclose(out, ref, atol=1e-4, rtol=1e-4), float(
        jnp.max(jnp.abs(out - ref)))

    print("KERNEL_OK")
</pallas_src>

<mosaic_0001>
module attributes {stable_mosaic.version = 11 : i64} {
  func.func @_gcn_class_kernel(%arg0: i32, %arg1: memref<2x16x8xf32, #tpu.memory_space<vmem>>, %arg2: memref<2x16x16xf32, #tpu.memory_space<vmem>>, %arg3: memref<152x32xf32, #tpu.memory_space<vmem>>, %arg4: memref<6x32xf32, #tpu.memory_space<vmem>>, %arg5: memref<2x4x16xf32, #tpu.memory_space<vmem>>) attributes {dimension_semantics = [#tpu.dimension_semantics<parallel>], iteration_bounds = array<i64: 1>, scalar_prefetch = 0 : i64, scratch_operands = 0 : i64, tpu.core_type = #tpu.core_type<tc>, window_params = [{transform_indices = @transform_0, window_bounds = array<i64: 2, 16, 8>}, {transform_indices = @transform_1, window_bounds = array<i64: 2, 16, 16>}, {pipeline_mode = #tpu.pipeline_mode<synchronous>, transform_indices = @transform_2, window_bounds = array<i64: 152, 32>}, {pipeline_mode = #tpu.pipeline_mode<synchronous>, transform_indices = @transform_3, window_bounds = array<i64: 6, 32>}, {transform_indices = @transform_4, window_bounds = array<i64: 2, 4, 16>}]} {
    %c0 = arith.constant 0 : index
    %c0_0 = arith.constant 0 : index
    %c0_1 = arith.constant 0 : index
    %0 = vector.load %arg1[%c0, %c0_0, %c0_1] : memref<2x16x8xf32, #tpu.memory_space<vmem>>, vector<2x16x8xf32>
    %c0_2 = arith.constant 0 : index
    %c0_3 = arith.constant 0 : index
    %c0_4 = arith.constant 0 : index
    %1 = vector.load %arg2[%c0_2, %c0_3, %c0_4] : memref<2x16x16xf32, #tpu.memory_space<vmem>>, vector<2x16x16xf32>
    %c0_5 = arith.constant 0 : index
    %c0_6 = arith.constant 0 : index
    %2 = vector.load %arg3[%c0_5, %c0_6] : memref<152x32xf32, #tpu.memory_space<vmem>>, vector<152x32xf32>
    %c0_7 = arith.constant 0 : index
    %c0_8 = arith.constant 0 : index
    %3 = vector.load %arg4[%c0_7, %c0_8] : memref<6x32xf32, #tpu.memory_space<vmem>>, vector<6x32xf32>
    %4 = vector.extract_strided_slice %2 {offsets = [0, 0], sizes = [8, 32], strides = [1, 1]} : vector<152x32xf32> to vector<8x32xf32>
    %5 = vector.extract_strided_slice %2 {offsets = [8, 0], sizes = [32, 32], strides = [1, 1]} : vector<152x32xf32> to vector<32x32xf32>
    %6 = vector.extract_strided_slice %2 {offsets = [40, 0], sizes = [32, 32], strides = [1, 1]} : vector<152x32xf32> to vector<32x32xf32>
    %7 = vector.extract_strided_slice %2 {offsets = [72, 0], sizes = [32, 32], strides = [1, 1]} : vector<152x32xf32> to vector<32x32xf32>
    %8 = vector.extract_strided_slice %2 {offsets = [104, 0], sizes = [32, 16], strides = [1, 1]} : vector<152x32xf32> to vector<32x16xf32>
    %9 = vector.extract_strided_slice %2 {offsets = [136, 0], sizes = [16, 4], strides = [1, 1]} : vector<152x32xf32> to vector<16x4xf32>
    %10 = vector.extract_strided_slice %3 {offsets = [0, 0], sizes = [1, 32], strides = [1, 1]} : vector<6x32xf32> to vector<1x32xf32>
    %11 = vector.extract_strided_slice %3 {offsets = [1, 0], sizes = [1, 32], strides = [1, 1]} : vector<6x32xf32> to vector<1x32xf32>
    %12 = vector.extract_strided_slice %3 {offsets = [2, 0], sizes = [1, 32], strides = [1, 1]} : vector<6x32xf32> to vector<1x32xf32>
    %13 = vector.extract_strided_slice %3 {offsets = [3, 0], sizes = [1, 32], strides = [1, 1]} : vector<6x32xf32> to vector<1x32xf32>
    %14 = vector.extract_strided_slice %3 {offsets = [4, 0], sizes = [1, 16], strides = [1, 1]} : vector<6x32xf32> to vector<1x16xf32>
    %15 = vector.extract_strided_slice %3 {offsets = [5, 0], sizes = [1, 4], strides = [1, 1]} : vector<6x32xf32> to vector<1x4xf32>
    %16 = vector.shape_cast %0 : vector<2x16x8xf32> to vector<32x8xf32>
    %17 = vector.shape_cast %16 : vector<32x8xf32> to vector<2x16x8xf32>
    "tpu.trace_start"() <{level = 10 : i32, message = "bnm,bmf->bnf"}> : () -> ()
    %cst = arith.constant dense<0.000000e+00> : vector<2x16x8xf32>
    %18 = tpu.matmul %1, %17, %cst {dimension_numbers = #tpu.dot_dimension_numbers<[2], [1], [1], [2], [0, 0, 0, 1, 1, 2], [0], [0]>} : vector<2x16x16xf32>, vector<2x16x8xf32>, vector<2x16x8xf32> -> vector<2x16x8xf32>
    "tpu.trace_stop"() : () -> ()
    %19 = vector.shape_cast %18 : vector<2x16x8xf32> to vector<32x8xf32>
    %cst_9 = arith.constant dense<0.000000e+00> : vector<32x32xf32>
    %20 = tpu.matmul %19, %4, %cst_9 {dimension_numbers = #tpu.dot_dimension_numbers<[1], [0], [0], [1], [0, 0, 1, 1], [], []>} : vector<32x8xf32>, vector<8x32xf32>, vector<32x32xf32> -> vector<32x32xf32>
    %21 = vector.broadcast %10 : vector<1x32xf32> to vector<32x32xf32>
    %22 = arith.addf %20, %21 : vector<32x32xf32>
    %cst_10 = arith.constant 0.000000e+00 : f32
    %23 = vector.broadcast %cst_10 : f32 to vector<32x32xf32>
    %24 = arith.maximumf %22, %23 : vector<32x32xf32>
    %cst_11 = arith.constant dense<0.000000e+00> : vector<32x32xf32>
    %25 = tpu.matmul %24, %5, %cst_11 {dimension_numbers = #tpu.dot_dimension_numbers<[1], [0], [0], [1], [0, 0, 1, 1], [], []>} : vector<32x32xf32>, vector<32x32xf32>, vector<32x32xf32> -> vector<32x32xf32>
    %26 = vector.shape_cast %25 : vector<32x32xf32> to vector<2x16x32xf32>
    "tpu.trace_start"() <{level = 10 : i32, message = "bnm,bmf->bnf"}> : () -> ()
    %cst_12 = arith.constant dense<0.000000e+00> : vector<2x16x32xf32>
    %27 = tpu.matmul %1, %26, %cst_12 {dimension_numbers = #tpu.dot_dimension_numbers<[2], [1], [1], [2], [0, 0, 0, 1, 1, 2], [0], [0]>} : vector<2x16x16xf32>, vector<2x16x32xf32>, vector<2x16x32xf32> -> vector<2x16x32xf32>
    "tpu.trace_stop"() : () -> ()
    %28 = vector.shape_cast %27 : vector<2x16x32xf32> to vector<32x32xf32>
    %29 = vector.broadcast %11 : vector<1x32xf32> to vector<32x32xf32>
    %30 = arith.addf %28, %29 : vector<32x32xf32>
    %cst_13 = arith.constant 0.000000e+00 : f32
    %31 = vector.broadcast %cst_13 : f32 to vector<32x32xf32>
    %32 = arith.maximumf %30, %31 : vector<32x32xf32>
    %cst_14 = arith.constant dense<0.000000e+00> : vector<32x32xf32>
    %33 = tpu.matmul %32, %6, %cst_14 {dimension_numbers = #tpu.dot_dimension_numbers<[1], [0], [0], [1], [0, 0, 1, 1], [], []>} : vector<32x32xf32>, vector<32x32xf32>, vector<32x32xf32> -> vector<32x32xf32>
    %34 = vector.shape_cast %33 : vector<32x32xf32> to vector<2x16x32xf32>
    "tpu.trace_start"() <{level = 10 : i32, message = "bnm,bmf->bnf"}> : () -> ()
    %cst_15 = arith.constant dense<0.000000e+00> : vector<2x16x32xf32>
    %35 = tpu.matmul %1, %34, %cst_15 {dimension_numbers = #tpu.dot_dimension_numbers<[2], [1], [1], [2], [0, 0, 0, 1, 1, 2], [0], [0]>} : vector<2x16x16xf32>, vector<2x16x32xf32>, vector<2x16x32xf32> -> vector<2x16x32xf32>
    "tpu.trace_stop"() : () -> ()
    %36 = vector.shape_cast %35 : vector<2x16x32xf32> to vector<32x32xf32>
    %37 = vector.broadcast %12 : vector<1x32xf32> to vector<32x32xf32>
    %38 = arith.addf %36, %37 : vector<32x32xf32>
    %cst_16 = arith.constant 0.000000e+00 : f32
    %39 = vector.broadcast %cst_16 : f32 to vector<32x32xf32>
    %40 = arith.maximumf %38, %39 : vector<32x32xf32>
    %cst_17 = arith.constant dense<0.000000e+00> : vector<32x32xf32>
    %41 = tpu.matmul %40, %7, %cst_17 {dimension_numbers = #tpu.dot_dimension_numbers<[1], [0], [0], [1], [0, 0, 1, 1], [], []>} : vector<32x32xf32>, vector<32x32xf32>, vector<32x32xf32> -> vector<32x32xf32>
    %42 = vector.broadcast %13 : vector<1x32xf32> to vector<32x32xf32>
    %43 = arith.addf %41, %42 : vector<32x32xf32>
    %cst_18 = arith.constant 0.000000e+00 : f32
    %44 = vector.broadcast %cst_18 : f32 to vector<32x32xf32>
    %45 = arith.maximumf %43, %44 : vector<32x32xf32>
    %cst_19 = arith.constant dense<0.000000e+00> : vector<32x16xf32>
    %46 = tpu.matmul %45, %8, %cst_19 {dimension_numbers = #tpu.dot_dimension_numbers<[1], [0], [0], [1], [0, 0, 1, 1], [], []>} : vector<32x32xf32>, vector<32x16xf32>, vector<32x16xf32> -> vector<32x16xf32>
    %47 = vector.broadcast %14 : vector<1x16xf32> to vector<32x16xf32>
    %48 = arith.addf %46, %47 : vector<32x16xf32>
    %cst_20 = arith.constant 0.000000e+00 : f32
    %49 = vector.broadcast %cst_20 : f32 to vector<32x16xf32>
    %50 = arith.maximumf %48, %49 : vector<32x16xf32>
    %cst_21 = arith.constant dense<0.000000e+00> : vector<32x4xf32>
    %51 = tpu.matmul %50, %9, %cst_21 {dimension_numbers = #tpu.dot_dimension_numbers<[1], [0], [0], [1], [0, 0, 1, 1], [], []>} : vector<32x16xf32>, vector<16x4xf32>, vector<32x4xf32> -> vector<32x4xf32>
    %52 = vector.broadcast %15 : vector<1x4xf32> to vector<32x4xf32>
    %53 = arith.addf %51, %52 : vector<32x4xf32>
    %cst_22 = arith.constant dense<0xFF800000> : vector<32xf32>
    %54 = vector.multi_reduction <maximumf>, %53, %cst_22 [1] : vector<32x4xf32> to vector<32xf32>
    %55 = vector.shape_cast %54 : vector<32xf32> to vector<32x1xf32>
    %56 = vector.broadcast %55 : vector<32x1xf32> to vector<32x4xf32>
    %57 = arith.subf %53, %56 : vector<32x4xf32>
    %58 = math.exp %57 : vector<32x4xf32>
    %cst_23 = arith.constant dense<0.000000e+00> : vector<32xf32>
    %59 = vector.multi_reduction <add>, %58, %cst_23 [1] : vector<32x4xf32> to vector<32xf32>
    %60 = vector.shape_cast %59 : vector<32xf32> to vector<32x1xf32>
    %61 = math.log %60 : vector<32x1xf32>
    %62 = vector.broadcast %61 : vector<32x1xf32> to vector<32x4xf32>
    %63 = arith.subf %57, %62 : vector<32x4xf32>
    %64 = tpu.transpose %63, [1, 0] : vector<32x4xf32> -> vector<4x32xf32>
    %65 = vector.extract_strided_slice %64 {offsets = [0, 0], sizes = [4, 16], strides = [1, 1]} : vector<4x32xf32> to vector<4x16xf32>
    %c0_24 = arith.constant 0 : index
    %c0_25 = arith.constant 0 : index
    %c0_26 = arith.constant 0 : index
    %66 = vector.load %arg5[%c0_24, %c0_25, %c0_26] : memref<2x4x16xf32, #tpu.memory_space<vmem>>, vector<1x4x16xf32>
    %67 = vector.shape_cast %66 : vector<1x4x16xf32> to vector<4x16xf32>
    %68 = vector.shape_cast %65 : vector<4x16xf32> to vector<1x4x16xf32>
    tpu.vector_store %arg5[%c0_24, %c0_25, %c0_26], %68 {strides = array<i32>} : memref<2x4x16xf32, #tpu.memory_space<vmem>>, vector<1x4x16xf32>,
    %69 = vector.extract_strided_slice %64 {offsets = [0, 16], sizes = [4, 16], strides = [1, 1]} : vector<4x32xf32> to vector<4x16xf32>
    %c1 = arith.constant 1 : index
    %c0_27 = arith.constant 0 : index
    %c0_28 = arith.constant 0 : index
    %70 = vector.load %arg5[%c1, %c0_27, %c0_28] : memref<2x4x16xf32, #tpu.memory_space<vmem>>, vector<1x4x16xf32>
    %71 = vector.shape_cast %70 : vector<1x4x16xf32> to vector<4x16xf32>
    %72 = vector.shape_cast %69 : vector<4x16xf32> to vector<1x4x16xf32>
    tpu.vector_store %arg5[%c1, %c0_27, %c0_28], %72 {strides = array<i32>} : memref<2x4x16xf32, #tpu.memory_space<vmem>>, vector<1x4x16xf32>,
    return
  }
  func.func @transform_0(%arg0: i32) -> (i32, i32, i32) {
    %c0_i32 = arith.constant 0 : i32
    %c0_i32_0 = arith.constant 0 : i32
    %c0_i32_1 = arith.constant 0 : i32
    return %arg0, %c0_i32, %c0_i32_0 : i32, i32, i32
  }
  func.func @transform_1(%arg0: i32) -> (i32, i32, i32) {
    %c0_i32 = arith.constant 0 : i32
    %c0_i32_0 = arith.constant 0 : i32
    %c0_i32_1 = arith.constant 0 : i32
    return %arg0, %c0_i32, %c0_i32_0 : i32, i32, i32
  }
  func.func @transform_2(%arg0: i32) -> (i32, i32) {
    %c0_i32 = arith.constant 0 : i32
    %c0_i32_0 = arith.constant 0 : i32
    %c0_i32_1 = arith.constant 0 : i32
    return %c0_i32, %c0_i32_0 : i32, i32
  }
  func.func @transform_3(%arg0: i32) -> (i32, i32) {
    %c0_i32 = arith.constant 0 : i32
    %c0_i32_0 = arith.constant 0 : i32
    %c0_i32_1 = arith.constant 0 : i32
    return %c0_i32, %c0_i32_0 : i32, i32
  }
  func.func @transform_4(%arg0: i32) -> (i32, i32, i32) {
    %c0_i32 = arith.constant 0 : i32
    %c0_i32_0 = arith.constant 0 : i32
    %c0_i32_1 = arith.constant 0 : i32
    return %arg0, %c0_i32, %c0_i32_0 : i32, i32, i32
  }
}

</mosaic_0001>

<bundles_post_ra>
// kernel: tpu_custom_call.1
= control target key start
LH: loop header
LB: loop body
LE: loop exit
PB: predicated region body
PF: predicated region fallthrough
CT: control target
= control target key end

     0   :  { %vm46_vm0 = vcmask 130048   ;;  %s857_s0 = inlined_call_operand.vmem [shape: f32[2,16,8], index: 0, kind: input, shape index: {}]   ;;  %s858_s1 = inlined_call_operand.vmem [shape: f32[2,16,16], index: 1, kind: input, shape index: {}]   ;;  %s859_s2 = inlined_call_operand.vmem [shape: f32[152,32], index: 2, kind: input, shape index: {}]   ;;  %s860_s3 = inlined_call_operand.vmem [shape: f32[6,32], index: 3, kind: input, shape index: {}]   ;;  %s861_s4 = inlined_call_operand.hbm [shape: f32[2,4,16], index: 4, kind: output, shape index: {}]  }
   0x1   :  { %v19_v0 = vld [vmem:[%s857_s0 + $0x8] sm:$0xff]  ;;  %v18_v1 = vld [vmem:[%s857_s0] sm:$0xff]  ;;  %v21_v4 = vld [vmem:[%s857_s0 + $0x18] sm:$0xff] }
   0x2   :  { %67 = vmatpush.msra.mxu0 %v19_v0  ;;  %622 = vmatpush.msra.mxu2 %v19_v0  ;;  %v711_v2 = vld [vmem:[%s858_s1] sm:$0xff]  ;;  %v716_v3 = vld [vmem:[%s858_s1 + $0x8] sm:$0xff]  ;;  %v20_v5 = vld [vmem:[%s857_s0 + $0x10] sm:$0xff] }
   0x3   :  { %96 = vmatpush.msra.mxu1 %v21_v4  ;;  %624 = vmatpush.msra.mxu3 %v21_v4 }
   0x4   :  { %9 = vsyncpa [#allocation3], 0  ;;  %68 = vmatpush.msra.mxu0 %v18_v1  ;;  %623 = vmatpush.msra.mxu2 %v18_v1  ;;  %v727_v6 = vld [vmem:[%s858_s1 + $0x10] sm:$0xff]  ;;  %v732_v7 = vld [vmem:[%s858_s1 + $0x18] sm:$0xff]  ;;  %vm106_vm1 = vcmask 64512   ;;  %vm152_vm2 = vcmask 261120  }
   0x5   :  { %586 = vmatmul.msk.f32.vlgmr.msra.gmra.mxu0 %vm46_vm0, %v711_v2  ;;  %587 = vmatmul.msk.f32.vlgmr.msra.gmra.mxu2 %vm46_vm0, %v716_v3  ;;  %v26_v8 = vld [vmem:[%s859_s2] sm:$0xff]  ;;  %v29_v14 = vld [vmem:[%s859_s2 + $0x18] sm:$0xff]  ;;  %v28_v15 = vld [vmem:[%s859_s2 + $0x10] sm:$0xff]  ;;  %vm479_vm3 = vcmask 31744   ;;  %vm560_vm4 = vcmask 125952   ;;  %s674_s14 = smov [#allocation2]  }
   0x6   :  { %97 = vmatpush.msra.mxu1 %v20_v5  ;;  %625 = vmatpush.msra.mxu3 %v20_v5  ;;  %v30_v9 = vld [vmem:[%s859_s2 + $0x20] sm:$0xff]  ;;  %v27_v16 = vld [vmem:[%s859_s2 + $0x8] sm:$0xff]  ;;  %v33_v33 = vld [vmem:[%s859_s2 + $0x38] sm:$0xff]  ;;  %s574_s17 = sshll.u32 %s861_s4, 4  ;;  %s675_s18 = smov 64   ;;  %s575_s17 = int_to_ptr.hbm [resolvable:$true] %s574_s17 }
   0x7   :  { %588 = vmatmul.msk.f32.vlgmr.msra.gmra.mxu1 %vm46_vm0, %v727_v6  ;;  %589 = vmatmul.msk.f32.vlgmr.msra.gmra.mxu3 %vm46_vm0, %v732_v7  ;;  %v760_v17 = vld [vmem:[%s860_s3] sm:$0x3f]  ;;  %v32_v37 = vld [vmem:[%s859_s2 + $0x30] sm:$0xff]  ;;  %v31_v38 = vld [vmem:[%s859_s2 + $0x28] sm:$0xff]  ;;  %s572_s3 = sshll.u32 %s674_s14, 4  ;;  %s676_s19 = smov 4   ;;  %s573_s3 = int_to_ptr.vmem [resolvable:$true] %s572_s3 }
   0x8   :  { %134 = vmatpush.msrb.mxu2 %v26_v8  ;;  %177 = vmatpush.msrb.mxu3 %v30_v9  ;;  %v105_v18 = vperm.slane %v760_v17, 0  ;;  %v34_v32 = vld [vmem:[%s859_s2 + $0x40] sm:$0xff]  ;;  %v240_v39 = vperm.slane %v760_v17, 1  ;;  %v37_v54 = vld [vmem:[%s859_s2 + $0x58] sm:$0xff]  ;;  %v36_v58 = vld [vmem:[%s859_s2 + $0x50] sm:$0xff]  ;;  %v336_v60 = vperm.slane %v760_v17, 2 }
   0x9   :  { %v38_v53 = vld [vmem:[%s859_s2 + $0x60] sm:$0xff]  ;;  %v35_v59 = vld [vmem:[%s859_s2 + $0x48] sm:$0xff] }
   0xa   :  { %178 = vmatpush.msrb.mxu3 %v29_v14  ;;  %273 = vmatpush.msra.mxu2 %v34_v32  ;;  %v42_v61 = vld [vmem:[%s859_s2 + $0x80] sm:$0xff] }
   0xc   :  { %179 = vmatpush.msrb.mxu3 %v28_v15  ;;  %274 = vmatpush.msra.mxu2 %v33_v33 }
   0xe   :  { %180 = vmatpush.msrb.mxu3 %v27_v16  ;;  %275 = vmatpush.msra.mxu2 %v32_v37 }
  0x10   :  { %276 = vmatpush.msra.mxu2 %v31_v38  ;;  %370 = vmatpush.msra.mxu3 %v38_v53 }
  0x12   :  { %371 = vmatpush.msra.mxu3 %v37_v54 }
  0x14   :  { %372 = vmatpush.msra.mxu3 %v36_v58 }
  0x16   :  { %373 = vmatpush.msra.mxu3 %v35_v59 }
  0x82   :  { %v70_v10 = vpop.f32.mrf.mxu0 }
  0x83   :  { %590 = vmatmul.msk.f32.vlgmr.msrb.gmra.mxu2 %vm106_vm1, %v70_v10  ;;  %v41_v10 = vld [vmem:[%s859_s2 + $0x78] sm:$0xff] }
  0x84   :  { %v99_v12 = vpop.f32.mrf.mxu1 }
  0x88   :  { %v73_v11 = vpop.f32.mrf.mxu2 }
  0x8a   :  { %v102_v13 = vpop.f32.mrf.mxu3 }
  0x8b   :  { %591 = vmatmul.msk.f32.gmra.mxu2 %vm106_vm1, %v73_v11  ;;  %v40_v11 = vld [vmem:[%s859_s2 + $0x70] sm:$0xff] }
  0x93   :  { %592 = vmatmul.msk.f32.gmra.mxu2 %vm106_vm1, %v99_v12  ;;  %v39_v12 = vld [vmem:[%s859_s2 + $0x68] sm:$0xff] }
  0x9b   :  { %593 = vmatmul.msk.f32.gmra.mxu2 %vm106_vm1, %v102_v13  ;;  %v345_v13 = vperm.slane %v760_v17, 3 }
 0x106   :  { %v136_v19 = vpop.f32.mrf.mxu2 }
 0x107   :  { %v137_v20 = vadd.f32 %v136_v19, %v105_v18 }
 0x109   :  { %v148_v21 = vmax.f32 %v137_v20, 0.0 }
 0x10b   :  { %594 = vmatmul.msk.f32.vlgmr.msrb.gmra.mxu3 %vm152_vm2, %v148_v21 }
 0x10e   :  { %v139_v22 = vpop.f32.mrf.mxu2 }
 0x10f   :  { %v140_v23 = vadd.f32 %v139_v22, %v105_v18 }
 0x111   :  { %v149_v24 = vmax.f32 %v140_v23, 0.0 }
 0x113   :  { %595 = vmatmul.msk.f32.gmra.mxu3 %vm152_vm2, %v149_v24 }
 0x116   :  { %v142_v25 = vpop.f32.mrf.mxu2 }
 0x117   :  { %v143_v26 = vadd.f32 %v142_v25, %v105_v18 }
 0x119   :  { %v150_v27 = vmax.f32 %v143_v26, 0.0 }
 0x11b   :  { %596 = vmatmul.msk.f32.gmra.mxu3 %vm152_vm2, %v150_v27  ;;  %v44_v27 = vld [vmem:[%s859_s2 + $0x90] sm:$0xff] }
 0x11e   :  { %v145_v28 = vpop.f32.mrf.mxu2 }
 0x11f   :  { %v146_v29 = vadd.f32 %v145_v28, %v105_v18  ;;  %v43_v28 = vld [vmem:[%s859_s2 + $0x88] sm:$0xff]  ;;  %s673_s2 = smov 112  }
 0x121   :  { %v151_v30 = vmax.f32 %v146_v29, 0.0  ;;  %v391_v29 = vperm.slane %v760_v17, 4 }
 0x123   :  { %597 = vmatmul.msk.f32.gmra.mxu3 %vm152_vm2, %v151_v30 }
 0x18e   :  { %v182_v31 = vpop.f32.mrf.mxu3 }
 0x196   :  { %v185_v34 = vpop.f32.mrf.mxu3 }
 0x197   :  { %208 = vmatpush.msrb.mxu0 %v185_v34 }
 0x199   :  { %209 = vmatpush.msrb.mxu0 %v182_v31 }
 0x19a   :  { %598 = vmatmul.msk.f32.vlgmr.msrb.gmra.mxu0 %vm46_vm0, %v711_v2 }
 0x19e   :  { %v188_v35 = vpop.f32.mrf.mxu3 }
 0x1a2   :  { %599 = vmatmul.msk.f32.gmra.mxu0 %vm46_vm0, %v716_v3 }
 0x1a6   :  { %v191_v36 = vpop.f32.mrf.mxu3 }
 0x1a7   :  { %231 = vmatpush.msrb.mxu1 %v191_v36 }
 0x1a9   :  { %232 = vmatpush.msrb.mxu1 %v188_v35 }
 0x1aa   :  { %600 = vmatmul.msk.f32.vlgmr.msrb.gmra.mxu1 %vm46_vm0, %v727_v6 }
 0x1b2   :  { %601 = vmatmul.msk.f32.gmra.mxu1 %vm46_vm0, %v732_v7 }
 0x217   :  { %v211_v40 = vpop.f32.mrf.mxu0 }
 0x218   :  { %v241_v41 = vadd.f32 %v240_v39, %v211_v40 }
 0x21a   :  { %v245_v42 = vmax.f32 %v241_v41, 0.0 }
 0x21c   :  { %602 = vmatmul.msk.f32.vlgmr.msra.gmra.mxu2 %vm152_vm2, %v245_v42  ;;  %v437_v42 = vperm.slane %v760_v17, 5 }
 0x21f   :  { %v214_v43 = vpop.f32.mrf.mxu0 }
 0x220   :  { %v242_v44 = vadd.f32 %v240_v39, %v214_v43 }
 0x222   :  { %v246_v45 = vmax.f32 %v242_v44, 0.0 }
 0x224   :  { %603 = vmatmul.msk.f32.gmra.mxu2 %vm152_vm2, %v246_v45 }
 0x227   :  { %v234_v46 = vpop.f32.mrf.mxu1 }
 0x228   :  { %v243_v47 = vadd.f32 %v240_v39, %v234_v46 }
 0x22a   :  { %v247_v48 = vmax.f32 %v243_v47, 0.0 }
 0x22c   :  { %604 = vmatmul.msk.f32.gmra.mxu2 %vm152_vm2, %v247_v48 }
 0x22f   :  { %v237_v49 = vpop.f32.mrf.mxu1 }
 0x230   :  { %v244_v50 = vadd.f32 %v240_v39, %v237_v49 }
 0x232   :  { %v248_v51 = vmax.f32 %v244_v50, 0.0 }
 0x234   :  { %605 = vmatmul.msk.f32.gmra.mxu2 %vm152_vm2, %v248_v51 }
 0x29f   :  { %v278_v52 = vpop.f32.mrf.mxu2 }
 0x2a7   :  { %v281_v55 = vpop.f32.mrf.mxu2 }
 0x2a8   :  { %304 = vmatpush.msra.mxu0 %v281_v55 }
 0x2aa   :  { %305 = vmatpush.msra.mxu0 %v278_v52 }
 0x2ab   :  { %606 = vmatmul.msk.f32.vlgmr.msra.gmra.mxu0 %vm46_vm0, %v711_v2 }
 0x2ac   :  { %416 = vmatpush.msrb.mxu0 %v42_v61 }
 0x2ae   :  { %417 = vmatpush.msrb.mxu0 %v41_v10 }
 0x2af   :  { %v284_v56 = vpop.f32.mrf.mxu2 }
 0x2b0   :  { %418 = vmatpush.msrb.mxu0 %v40_v11 }
 0x2b2   :  { %419 = vmatpush.msrb.mxu0 %v39_v12 }
 0x2b3   :  { %607 = vmatmul.msk.f32.gmra.mxu0 %vm46_vm0, %v716_v3 }
 0x2b7   :  { %v287_v57 = vpop.f32.mrf.mxu2 }
 0x2b8   :  { %327 = vmatpush.msra.mxu1 %v287_v57 }
 0x2ba   :  { %328 = vmatpush.msra.mxu1 %v284_v56 }
 0x2bb   :  { %608 = vmatmul.msk.f32.vlgmr.msra.gmra.mxu1 %vm46_vm0, %v727_v6 }
 0x2bc   :  { %464 = vmatpush.msrb.mxu1 %v44_v27 }
 0x2be   :  { %465 = vmatpush.msrb.mxu1 %v43_v28 }
 0x2c3   :  { %609 = vmatmul.msk.f32.gmra.mxu1 %vm46_vm0, %v732_v7 }
 0x328   :  { %v307_v62 = vpop.f32.mrf.mxu0 }
 0x329   :  { %v337_v63 = vadd.f32 %v336_v60, %v307_v62 }
 0x32b   :  { %v341_v0 = vmax.f32 %v337_v63, 0.0 }
 0x32d   :  { %610 = vmatmul.msk.f32.vlgmr.msra.gmra.mxu3 %vm152_vm2, %v341_v0 }
 0x330   :  { %v310_v1 = vpop.f32.mrf.mxu0 }
 0x331   :  { %v338_v2 = vadd.f32 %v336_v60, %v310_v1 }
 0x333   :  { %v342_v3 = vmax.f32 %v338_v2, 0.0 }
 0x335   :  { %611 = vmatmul.msk.f32.gmra.mxu3 %vm152_vm2, %v342_v3 }
 0x338   :  { %v330_v4 = vpop.f32.mrf.mxu1 }
 0x339   :  { %v339_v5 = vadd.f32 %v336_v60, %v330_v4 }
 0x33b   :  { %v343_v6 = vmax.f32 %v339_v5, 0.0 }
 0x33d   :  { %612 = vmatmul.msk.f32.gmra.mxu3 %vm152_vm2, %v343_v6 }
 0x340   :  { %v333_v7 = vpop.f32.mrf.mxu1 }
 0x341   :  { %v340_v8 = vadd.f32 %v336_v60, %v333_v7 }
 0x343   :  { %v344_v9 = vmax.f32 %v340_v8, 0.0 }
 0x345   :  { %613 = vmatmul.msk.f32.gmra.mxu3 %vm152_vm2, %v344_v9 }
 0x3b0   :  { %v375_v14 = vpop.f32.mrf.mxu3 }
 0x3b1   :  { %v376_v15 = vadd.f32 %v375_v14, %v345_v13 }
 0x3b3   :  { %v387_v16 = vmax.f32 %v376_v15, 0.0 }
 0x3b5   :  { %614 = vmatmul.msk.f32.vlgmr.msrb.gmra.mxu0 %vm152_vm2, %v387_v16 }
 0x3b8   :  { %v378_v18 = vpop.f32.mrf.mxu3 }
 0x3b9   :  { %v379_v19 = vadd.f32 %v378_v18, %v345_v13 }
 0x3bb   :  { %v388_v20 = vmax.f32 %v379_v19, 0.0 }
 0x3bd   :  { %615 = vmatmul.msk.f32.gmra.mxu0 %vm152_vm2, %v388_v20 }
 0x3c0   :  { %v381_v21 = vpop.f32.mrf.mxu3 }
 0x3c1   :  { %v382_v22 = vadd.f32 %v381_v21, %v345_v13 }
 0x3c3   :  { %v389_v23 = vmax.f32 %v382_v22, 0.0 }
 0x3c5   :  { %616 = vmatmul.msk.f32.gmra.mxu0 %vm152_vm2, %v389_v23 }
 0x3c8   :  { %v384_v24 = vpop.f32.mrf.mxu3 }
 0x3c9   :  { %v385_v25 = vadd.f32 %v384_v24, %v345_v13 }
 0x3cb   :  { %v390_v26 = vmax.f32 %v385_v25, 0.0 }
 0x3cd   :  { %617 = vmatmul.msk.f32.gmra.mxu0 %vm152_vm2, %v390_v26 }
 0x432   :  { %v421_v30 = vpop.f32.mrf.mxu0 }
 0x433   :  { %v422_v31 = vadd.f32 %v421_v30, %v391_v29 }
 0x435   :  { %v433_v32 = vmax.f32 %v422_v31, 0.0 }
 0x437   :  { %618 = vmatmul.msk.f32.vlgmr.msrb.gmra.mxu1 %vm46_vm0, %v433_v32 }
 0x43a   :  { %v424_v33 = vpop.f32.mrf.mxu0 }
 0x43b   :  { %v425_v34 = vadd.f32 %v424_v33, %v391_v29 }
 0x43d   :  { %v434_v35 = vmax.f32 %v425_v34, 0.0 }
 0x43f   :  { %619 = vmatmul.msk.f32.gmra.mxu1 %vm46_vm0, %v434_v35 }
 0x442   :  { %v427_v36 = vpop.f32.mrf.mxu0 }
 0x443   :  { %v428_v37 = vadd.f32 %v427_v36, %v391_v29 }
 0x445   :  { %v435_v38 = vmax.f32 %v428_v37, 0.0 }
 0x447   :  { %620 = vmatmul.msk.f32.gmra.mxu1 %vm46_vm0, %v435_v38 }
 0x44a   :  { %v430_v39 = vpop.f32.mrf.mxu0 }
 0x44b   :  { %v431_v40 = vadd.f32 %v430_v39, %v391_v29 }
 0x44d   :  { %v436_v41 = vmax.f32 %v431_v40, 0.0 }
 0x44f   :  { %621 = vmatmul.msk.f32.gmra.mxu1 %vm46_vm0, %v436_v41 }
 0x4b4   :  { %v467_v43 = vpop.f32.mrf.mxu1 }
 0x4b5   :  { %v468_v44 = vadd.f32 %v467_v43, %v437_v42 }
 0x4b7   :  { %v480_v45 = vsel %vm479_vm3, %v468_v44, -inf }
 0x4b8   :  { %481 = vmax.xlane.f32.xlu0 %v480_v45 }
 0x4bc   :  { %v470_v46 = vpop.f32.mrf.mxu1 }
 0x4bd   :  { %v471_v47 = vadd.f32 %v470_v46, %v437_v42 }
 0x4bf   :  { %v483_v48 = vsel %vm479_vm3, %v471_v47, -inf }
 0x4c0   :  { %484 = vmax.xlane.f32.xlu0 %v483_v48 }
 0x4c4   :  { %v473_v49 = vpop.f32.mrf.mxu1 }
 0x4c5   :  { %v474_v50 = vadd.f32 %v473_v49, %v437_v42 }
 0x4c7   :  { %v486_v51 = vsel %vm479_vm3, %v474_v50, -inf }
 0x4c8   :  { %487 = vmax.xlane.f32.xlu1 %v486_v51 }
 0x4cc   :  { %v476_v52 = vpop.f32.mrf.mxu1 }
 0x4cd   :  { %v477_v53 = vadd.f32 %v476_v52, %v437_v42 }
 0x4cf   :  { %v489_v17 = vsel %vm479_vm3, %v477_v53, -inf }
 0x4d0   :  { %490 = vmax.xlane.f32.xlu1 %v489_v17 }
 0x52b   :  { %v482_v54 = vpop.xlane.xlu0 %481 }
 0x52c   :  { %v492_v55 = vsub.f32 %v468_v44, %v482_v54 }
 0x52e   :  { %v496_v56 = vmul.f32 1.442695, %v492_v55 }
 0x530   :  { %631 = vpow2.f32 %v496_v56 }
 0x533   :  { %v485_v57 = vpop.xlane.xlu0 %484 }
 0x534   :  { %v493_v58 = vsub.f32 %v471_v47, %v485_v57 }
 0x536   :  { %v632_v59 = vpop.eup %631  ;;  %v498_v60 = vmul.f32 1.442695, %v493_v58 }
 0x537   :  { %v504_v61 = vsel %vm479_vm3, %v632_v59, 0.0 }
 0x538   :  { %633 = vpow2.f32 %v498_v60  ;;  %505 = vadd.xlane.f32.xlu2 %v504_v61 }
 0x53b   :  { %v488_v62 = vpop.xlane.xlu1 %487 }
 0x53c   :  { %v494_v63 = vsub.f32 %v474_v50, %v488_v62 }
 0x53e   :  { %v634_v0 = vpop.eup %633  ;;  %v500_v1 = vmul.f32 1.442695, %v494_v63 }
 0x53f   :  { %v507_v2 = vsel %vm479_vm3, %v634_v0, 0.0 }
 0x540   :  { %635 = vpow2.f32 %v500_v1  ;;  %508 = vadd.xlane.f32.xlu2 %v507_v2 }
 0x543   :  { %v491_v3 = vpop.xlane.xlu1 %490 }
 0x544   :  { %v495_v4 = vsub.f32 %v477_v53, %v491_v3 }
 0x546   :  { %v636_v5 = vpop.eup %635  ;;  %v502_v6 = vmul.f32 1.442695, %v495_v4 }
 0x547   :  { %v510_v7 = vsel %vm479_vm3, %v636_v5, 0.0 }
 0x548   :  { %637 = vpow2.f32 %v502_v6  ;;  %511 = vadd.xlane.f32.xlu0 %v510_v7 }
 0x54e   :  { %v638_v8 = vpop.eup %637 }
 0x54f   :  { %v513_v9 = vsel %vm479_vm3, %v638_v8, 0.0 }
 0x550   :  { %514 = vadd.xlane.f32.xlu1 %v513_v9 }
 0x5ab   :  { %v506_v10 = vpop.xlane.xlu2 %505 }
 0x5ac   :  { %639 = vlog2.f32 %v506_v10 }
 0x5b2   :  { %v640_v11 = vpop.eup %639 }
 0x5b3   :  { %v517_v12 = vmul.f32 0.6931472, %v640_v11  ;;  %v509_v13 = vpop.xlane.xlu2 %508 }
 0x5b4   :  { %641 = vlog2.f32 %v509_v13 }
 0x5b5   :  { %v524_v14 = vsub.f32 %v492_v55, %v517_v12 }
 0x5b7   :  { %528 = vxpose.xlu2.b32.start [1/4] (short) (narrow) %v524_v14, 8 }
 0x5ba   :  { %v642_v15 = vpop.eup %641 }
 0x5bb   :  { %v519_v16 = vmul.f32 0.6931472, %v642_v15  ;;  %v512_v18 = vpop.xlane.xlu0 %511 }
 0x5bc   :  { %643 = vlog2.f32 %v512_v18 }
 0x5bd   :  { %v525_v19 = vsub.f32 %v493_v58, %v519_v16 }
 0x5bf   :  { %529 = vxpose.xlu2.b32.cont [2/4] (short) (narrow) %v525_v19, 8 }
 0x5c2   :  { %v644_v20 = vpop.eup %643 }
 0x5c3   :  { %v521_v21 = vmul.f32 0.6931472, %v644_v20  ;;  %v515_v22 = vpop.xlane.xlu1 %514 }
 0x5c4   :  { %645 = vlog2.f32 %v515_v22 }
 0x5c5   :  { %v526_v23 = vsub.f32 %v494_v63, %v521_v21 }
 0x5c7   :  { %530 = vxpose.xlu2.b32.cont [3/4] (short) (narrow) %v526_v23, 8 }
 0x5ca   :  { %v646_v24 = vpop.eup %645 }
 0x5cb   :  { %v523_v25 = vmul.f32 0.6931472, %v646_v24 }
 0x5cd   :  { %v527_v26 = vsub.f32 %v495_v4, %v523_v25 }
 0x5cf   :  { %531 = vxpose.xlu2.b32.end [4/4] (short) (narrow) %v527_v26, 8 }
 0x650   :  { %v544_v27 = vpop.trf.xlu2 }
 0x651   :  { %561 = vst.msk [vmem:[#allocation2] sm:$0xf] %vm560_vm4, %v544_v27  ;;  %563 = vrot.lane.b32.xlu0 %v544_v27, %s673_s2 }
 0x6c3   :  { %v564_v28 = vpop.permute.xlu0 %563 }
 0x6c4   :  { %567 = vst.msk [vmem:[#allocation2 + $0x4] sm:$0xf] %vm560_vm4, %v564_v28 }
 0x6c5   :  { %580 = dma.vmem_to_hbm [thread:$0]  %s573_s3, 128, %s575_s17, [#allocation3], %s675_s18, %s675_s18, %s676_s19  }
 0x6c6   :  { %671 = dma.done.wait [#allocation3], 128  }
 0x6c7   :  { %672 = vsyncadd [#allocation3], 4294967168 }
 0x6c8   :  { %585 = vsyncpa [#allocation3], 1 }

</bundles_post_ra>
